<compile_context>
chip_gen: v6e
topology: v6e:2x2x1
jax: 0.10.0
libtpu: 0.0.40
codegen_flags: <defaults>
</compile_context>

<pallas_src>
import jax
import jax.numpy as jnp
from jax.experimental import pallas as pl
from jax.experimental.pallas import tpu as pltpu

SUBLANE = 8


def _round_up(x, m):
    return ((x + m - 1) // m) * m


def _choose_batch_tiling(batch, block_b):
    """Pick (tile_rows, padded_batch); prefer an even grid when multi-step."""
    tb = min(block_b, _round_up(batch, SUBLANE))
    steps = pl.cdiv(batch, tb)
    if steps > 1 and steps % 2 == 1:
        # v7x megacore: an odd step count leaves one TensorCore idle for the
        # last tile; shrink the tile slightly so the grid splits 50/50.
        tb = _round_up(pl.cdiv(batch, steps + 1), SUBLANE)
        steps = pl.cdiv(batch, tb)
    return tb, steps * tb


def dqn_kernel(obs_ref, w1_ref, b1_ref, w2_ref, b2_ref, out_ref):
    # relu(obs @ w1 + b1) @ w2 + b2 on VMEM-resident tiles, f32 throughout.
    x = obs_ref[...]                                               # [TB, D]
    h = jnp.dot(x, w1_ref[...], preferred_element_type=jnp.float32)
    h = jnp.maximum(h + b1_ref[...], 0.0)                          # [TB, H]
    q = jnp.dot(h, w2_ref[...], preferred_element_type=jnp.float32)
    out_ref[...] = q + b2_ref[...]                                 # [TB, A]


def dqn_forward(obs, w1, b1, w2, b2, *, block_b=1024):
    """q = relu(obs @ w1 + b1) @ w2 + b2 via a fused Pallas TPU kernel.

    obs: [B, D] f32, w1: [D, H], b1: [H], w2: [H, A], b2: [A]
    (weights stored as the transpose of PyTorch nn.Linear's [out, in]).
    """
    B, D = obs.shape
    H = w1.shape[1]
    A = w2.shape[1]

    TB, Bp = _choose_batch_tiling(B, block_b)
    # Only the batch dim is (cheaply) zero-padded; feature dims stay unpadded.
    obs_p = jnp.pad(obs, ((0, Bp - B), (0, 0))) if Bp != B else obs

    b1_2d = b1.reshape(1, H).astype(jnp.float32)
    b2_2d = b2.reshape(1, A).astype(jnp.float32)

    vmem = pltpu.MemorySpace.VMEM
    resident = pl.Buffered(buffer_count=1)   # constant-index operands
    grid = (Bp // TB,)

    cost = pl.CostEstimate(
        flops=2 * Bp * (D * H + H * A),
        transcendentals=0,
        bytes_accessed=4 * (Bp * D + D * H + H + H * A + A + Bp * A),
    )

    out_p = pl.pallas_call(
        dqn_kernel,
        out_shape=jax.ShapeDtypeStruct((Bp, A), jnp.float32),
        grid_spec=pltpu.PrefetchScalarGridSpec(
            num_scalar_prefetch=0,
            grid=grid,
            in_specs=[
                # obs tiles stream over the batch grid axis (double-buffered).
                pl.BlockSpec((TB, D), lambda i: (i, 0), memory_space=vmem),
                # weights/biases: constant index_map -> fetched once and kept
                # VMEM-resident with a single buffer for the whole grid.
                pl.BlockSpec((D, H), lambda i: (0, 0), memory_space=vmem,
                             pipeline_mode=resident),
                pl.BlockSpec((1, H), lambda i: (0, 0), memory_space=vmem,
                             pipeline_mode=resident),
                pl.BlockSpec((H, A), lambda i: (0, 0), memory_space=vmem,
                             pipeline_mode=resident),
                pl.BlockSpec((1, A), lambda i: (0, 0), memory_space=vmem,
                             pipeline_mode=resident),
            ],
            out_specs=pl.BlockSpec((TB, A), lambda i: (i, 0),
                                   memory_space=vmem),
        ),
        compiler_params=pltpu.CompilerParams(
            dimension_semantics=("parallel",),   # batch axis -> megacore
            vmem_limit_bytes=48 * 1024 * 1024,   # headroom for large batch tiles
        ),
        cost_estimate=cost,
    )(obs_p, w1, b1_2d, w2, b2_2d)

    return out_p[:B] if Bp != B else out_p


def init_params(key, input_dim, action_dim, hidden_dim):
    # Deterministic init mimicking nn.Linear's uniform(-1/sqrt(fan_in), +...).
    k1, k2, k3, k4 = jax.random.split(key, 4)
    lim1 = 1.0 / jnp.sqrt(jnp.float32(input_dim))
    lim2 = 1.0 / jnp.sqrt(jnp.float32(hidden_dim))
    w1 = jax.random.uniform(k1, (input_dim, hidden_dim), jnp.float32, -lim1, lim1)
    b1 = jax.random.uniform(k2, (hidden_dim,), jnp.float32, -lim1, lim1)
    w2 = jax.random.uniform(k3, (hidden_dim, action_dim), jnp.float32, -lim2, lim2)
    b2 = jax.random.uniform(k4, (action_dim,), jnp.float32, -lim2, lim2)
    return w1, b1, w2, b2


def _ref_forward(obs, w1, b1, w2, b2):
    h = jnp.maximum(
        jnp.dot(obs, w1, precision=jax.lax.Precision.HIGHEST) + b1, 0.0)
    return jnp.dot(h, w2, precision=jax.lax.Precision.HIGHEST) + b2


if __name__ == "__main__":
    key = jax.random.PRNGKey(0)
    B, input_dim, hidden_dim, action_dim = 8, 16, 32, 4

    k_obs, k_params, k_big = jax.random.split(key, 3)
    obs = jax.random.normal(k_obs, (B, input_dim), jnp.float32)
    w1, b1, w2, b2 = init_params(k_params, input_dim, action_dim, hidden_dim)

    # Small-batch check (single 8-row tile, unpadded feature dims).
    q_values = jax.block_until_ready(dqn_forward(obs, w1, b1, w2, b2))
    ref = _ref_forward(obs, w1, b1, w2, b2)
    assert q_values.shape == (B, action_dim)
    assert jnp.allclose(q_values, ref, atol=2e-2, rtol=2e-2), float(
        jnp.max(jnp.abs(q_values - ref)))

    # Non-multiple-of-8 batch exercises batch padding + row slicing.
    obs_big = jax.random.normal(k_big, (300, input_dim), jnp.float32)
    q_big = jax.block_until_ready(dqn_forward(obs_big, w1, b1, w2, b2))
    ref_big = _ref_forward(obs_big, w1, b1, w2, b2)
    assert q_big.shape == (300, action_dim)
    assert jnp.allclose(q_big, ref_big, atol=2e-2, rtol=2e-2), float(
        jnp.max(jnp.abs(q_big - ref_big)))

    # Multi-step grid path (batch tiled into an even number of grid steps).
    obs_tiled = jax.random.normal(k_big, (2500, input_dim), jnp.float32)
    q_t = jax.block_until_ready(
        dqn_forward(obs_tiled, w1, b1, w2, b2, block_b=512))
    ref_t = _ref_forward(obs_tiled, w1, b1, w2, b2)
    assert q_t.shape == (2500, action_dim)
    assert jnp.allclose(q_t, ref_t, atol=2e-2, rtol=2e-2), float(
        jnp.max(jnp.abs(q_t - ref_t)))

    print("KERNEL_OK")
</pallas_src>

<mosaic_0001>
module attributes {stable_mosaic.version = 11 : i64} {
  func.func @dqn_kernel(%arg0: i32, %arg1: memref<8x16xf32, #tpu.memory_space<vmem>>, %arg2: memref<16x32xf32, #tpu.memory_space<vmem>>, %arg3: memref<1x32xf32, #tpu.memory_space<vmem>>, %arg4: memref<32x4xf32, #tpu.memory_space<vmem>>, %arg5: memref<1x4xf32, #tpu.memory_space<vmem>>, %arg6: memref<8x4xf32, #tpu.memory_space<vmem>>) attributes {dimension_semantics = [#tpu.dimension_semantics<parallel>], iteration_bounds = array<i64: 1>, scalar_prefetch = 0 : i64, scratch_operands = 0 : i64, tpu.core_type = #tpu.core_type<tc>, window_params = [{transform_indices = @transform_0, window_bounds = array<i64: 8, 16>}, {pipeline_mode = #tpu.pipeline_mode<synchronous>, transform_indices = @transform_1, window_bounds = array<i64: 16, 32>}, {pipeline_mode = #tpu.pipeline_mode<synchronous>, transform_indices = @transform_2, window_bounds = array<i64: 1, 32>}, {pipeline_mode = #tpu.pipeline_mode<synchronous>, transform_indices = @transform_3, window_bounds = array<i64: 32, 4>}, {pipeline_mode = #tpu.pipeline_mode<synchronous>, transform_indices = @transform_4, window_bounds = array<i64: 1, 4>}, {transform_indices = @transform_5, window_bounds = array<i64: 8, 4>}]} {
    %c0 = arith.constant 0 : index
    %c0_0 = arith.constant 0 : index
    %0 = vector.load %arg1[%c0, %c0_0] : memref<8x16xf32, #tpu.memory_space<vmem>>, vector<8x16xf32>
    %c0_1 = arith.constant 0 : index
    %c0_2 = arith.constant 0 : index
    %1 = vector.load %arg2[%c0_1, %c0_2] : memref<16x32xf32, #tpu.memory_space<vmem>>, vector<16x32xf32>
    %cst = arith.constant dense<0.000000e+00> : vector<8x32xf32>
    %2 = tpu.matmul %0, %1, %cst {dimension_numbers = #tpu.dot_dimension_numbers<[1], [0], [0], [1], [0, 0, 1, 1], [], []>} : vector<8x16xf32>, vector<16x32xf32>, vector<8x32xf32> -> vector<8x32xf32>
    %c0_3 = arith.constant 0 : index
    %c0_4 = arith.constant 0 : index
    %3 = vector.load %arg3[%c0_3, %c0_4] : memref<1x32xf32, #tpu.memory_space<vmem>>, vector<1x32xf32>
    %4 = vector.broadcast %3 : vector<1x32xf32> to vector<8x32xf32>
    %5 = arith.addf %2, %4 : vector<8x32xf32>
    %cst_5 = arith.constant 0.000000e+00 : f32
    %6 = vector.broadcast %cst_5 : f32 to vector<8x32xf32>
    %7 = arith.maximumf %5, %6 : vector<8x32xf32>
    %c0_6 = arith.constant 0 : index
    %c0_7 = arith.constant 0 : index
    %8 = vector.load %arg4[%c0_6, %c0_7] : memref<32x4xf32, #tpu.memory_space<vmem>>, vector<32x4xf32>
    %cst_8 = arith.constant dense<0.000000e+00> : vector<8x4xf32>
    %9 = tpu.matmul %7, %8, %cst_8 {dimension_numbers = #tpu.dot_dimension_numbers<[1], [0], [0], [1], [0, 0, 1, 1], [], []>} : vector<8x32xf32>, vector<32x4xf32>, vector<8x4xf32> -> vector<8x4xf32>
    %c0_9 = arith.constant 0 : index
    %c0_10 = arith.constant 0 : index
    %10 = vector.load %arg5[%c0_9, %c0_10] : memref<1x4xf32, #tpu.memory_space<vmem>>, vector<1x4xf32>
    %11 = vector.broadcast %10 : vector<1x4xf32> to vector<8x4xf32>
    %12 = arith.addf %9, %11 : vector<8x4xf32>
    %c0_11 = arith.constant 0 : index
    %c0_12 = arith.constant 0 : index
    %13 = vector.load %arg6[%c0_11, %c0_12] : memref<8x4xf32, #tpu.memory_space<vmem>>, vector<8x4xf32>
    tpu.vector_store %arg6[%c0_11, %c0_12], %12 {strides = array<i32>} : memref<8x4xf32, #tpu.memory_space<vmem>>, vector<8x4xf32>,
    return
  }
  func.func @transform_0(%arg0: i32) -> (i32, i32) {
    %c0_i32 = arith.constant 0 : i32
    %c0_i32_0 = arith.constant 0 : i32
    return %arg0, %c0_i32 : i32, i32
  }
  func.func @transform_1(%arg0: i32) -> (i32, i32) {
    %c0_i32 = arith.constant 0 : i32
    %c0_i32_0 = arith.constant 0 : i32
    %c0_i32_1 = arith.constant 0 : i32
    return %c0_i32, %c0_i32_0 : i32, i32
  }
  func.func @transform_2(%arg0: i32) -> (i32, i32) {
    %c0_i32 = arith.constant 0 : i32
    %c0_i32_0 = arith.constant 0 : i32
    %c0_i32_1 = arith.constant 0 : i32
    return %c0_i32, %c0_i32_0 : i32, i32
  }
  func.func @transform_3(%arg0: i32) -> (i32, i32) {
    %c0_i32 = arith.constant 0 : i32
    %c0_i32_0 = arith.constant 0 : i32
    %c0_i32_1 = arith.constant 0 : i32
    return %c0_i32, %c0_i32_0 : i32, i32
  }
  func.func @transform_4(%arg0: i32) -> (i32, i32) {
    %c0_i32 = arith.constant 0 : i32
    %c0_i32_0 = arith.constant 0 : i32
    %c0_i32_1 = arith.constant 0 : i32
    return %c0_i32, %c0_i32_0 : i32, i32
  }
  func.func @transform_5(%arg0: i32) -> (i32, i32) {
    %c0_i32 = arith.constant 0 : i32
    %c0_i32_0 = arith.constant 0 : i32
    return %arg0, %c0_i32 : i32, i32
  }
}

</mosaic_0001>

<bundles_post_ra>
// kernel: tpu_custom_call.1
= control target key start
LH: loop header
LB: loop body
LE: loop exit
PB: predicated region body
PF: predicated region fallthrough
CT: control target
= control target key end

     0   :  { %v228_v0 = vmov 0.0   ;;  %vm229_vm0 = vmmov 0   ;;  %vm30_vm1 = vcmask 130048   ;;  %vm116_vm2 = vcmask 261120   ;;  %s290_s1 = inlined_call_operand.vmem [shape: f32[16,32], index: 1, kind: input, shape index: {}]   ;;  %s291_s0 = inlined_call_operand.vmem [shape: f32[8,16], index: 0, kind: input, shape index: {}]   ;;  %s292_s3 = inlined_call_operand.vmem [shape: f32[32,4], index: 3, kind: input, shape index: {}]   ;;  %s293_s2 = inlined_call_operand.vmem [shape: f32[1,32], index: 2, kind: input, shape index: {}]   ;;  %s294_s4 = inlined_call_operand.vmem [shape: f32[1,4], index: 4, kind: input, shape index: {}]   ;;  %s295_s5 = inlined_call_operand.vmem [shape: f32[8,4], index: 5, kind: output, shape index: {}]  }
   0x1   :  { %208 = vmatprep.subr.mxu0 %v228_v0  ;;  %v22_v1 = vld [vmem:[%s290_s1 + $0x8] sm:$0xff]  ;;  %v21_v2 = vld [vmem:[%s290_s1] sm:$0xff]  ;;  %212 = vmatprep.mubr.msk.f32.mxu0 %vm229_vm0, %v228_v0  ;;  %v108_v4 = vld [vmem:[%s292_s3 + $0x18] sm:$0xff]  ;;  %vm190_vm3 = vcmask 31744  }
   0x2   :  { %209 = vmatpush3.msra.mxu0 %v22_v1  ;;  %v20_v3 = vld [vmem:[%s291_s0] sm:$0xff]  ;;  %215 = vmatprep.subr.mxu1 %v228_v0  ;;  %v107_v5 = vld [vmem:[%s292_s3 + $0x10] sm:$0xff]  ;;  %v106_v6 = vld [vmem:[%s292_s3 + $0x8] sm:$0xff] }
   0x3   :  { %210 = vmatprep.subr.mxu0 %v228_v0  ;;  %216 = vmatpush3.msra.mxu1 %v108_v4  ;;  %v105_v7 = vld [vmem:[%s292_s3] sm:$0xff] }
   0x4   :  { %211 = vmatpush3.msra.mxu0 %v21_v2  ;;  %217 = vmatprep.subr.mxu1 %v228_v0  ;;  %v196_v8 = vld [vmem:[%s293_s2] ss:$0 sm:$0xff] }
   0x5   :  { %213 = vmatmul.mubr.msk.f32.vlgmr.msra.gmra.mxu0 %vm30_vm1, %v20_v3  ;;  %223 = vmatprep.mubr.msk.f32.mxu1 %vm229_vm0, %v228_v0  ;;  %v198_v13 = vld [vmem:[%s294_s4] ss:$0 sm:$0xff] }
   0x6   :  { %218 = vmatpush3.msra.mxu1 %v107_v5 }
   0x7   :  { %219 = vmatprep.subr.mxu1 %v228_v0 }
   0x8   :  { %220 = vmatpush3.msra.mxu1 %v106_v6 }
   0x9   :  { %221 = vmatprep.subr.mxu1 %v228_v0 }
   0xa   :  { %222 = vmatpush3.msra.mxu1 %v105_v7 }
  0xc5   :  { %v100_v9 = vpop.f32.mrf.mxu0 }
  0xc6   :  { %v101_v10 = vadd.f32 %v196_v8, %v100_v9 }
  0xc7   :  { %v214_v11 = vpop.f32.mrf.mxu0 }
  0xc8   :  { %v104_v12 = vmax.f32 %v101_v10, 0.0 }
  0xca   :  { %224 = vmatmul.mubr.msk.f32.vlgmr.msra.gmra.mxu1 %vm116_vm2, %v104_v12 }
 0x18a   :  { %v186_v14 = vpop.f32.mrf.mxu1 }
 0x18b   :  { %v187_v15 = vadd.f32 %v198_v13, %v186_v14 }
 0x18c   :  { %v225_v16 = vpop.f32.mrf.mxu1 }
 0x18d   :  { %191 = vst.msk [vmem:[%s295_s5] sm:$0xff] %vm190_vm3, %v187_v15 }

</bundles_post_ra>
